<compile_context>
chip_gen: v7x
topology: tpu7x:2x2x1
jax: 0.10.0
libtpu: 0.0.40
codegen_flags: <defaults>
</compile_context>

<pallas_src>
import functools

import jax
import jax.numpy as jnp
from jax.experimental import pallas as pl
from jax.experimental.pallas import tpu as pltpu


def _ceil_to(x, m):
    return -(-x // m) * m


def _bilinear_glu_kernel_single_k(a_ref, wv_ref, bc_ref, o_ref):
    """Whole K in one tile: no accumulators, no K grid axis, single store."""
    a_tile = a_ref[...]
    p = jnp.dot(a_tile, wv_ref[0], preferred_element_type=jnp.float32)
    q = jnp.dot(a_tile, wv_ref[1], preferred_element_type=jnp.float32)
    p = p + bc_ref[0].astype(jnp.float32)
    q = q + bc_ref[1].astype(jnp.float32)
    o_ref[...] = (p * q).astype(o_ref.dtype)


def _bilinear_glu_kernel_k_loop(a_ref, wv_ref, bc_ref, o_ref,
                                acc_p_ref, acc_q_ref):
    """K as the trailing 'arbitrary' axis, f32 VMEM accumulators."""
    k = pl.program_id(2)

    @pl.when(k == 0)
    def _():
        acc_p_ref[...] = jnp.zeros_like(acc_p_ref)
        acc_q_ref[...] = jnp.zeros_like(acc_q_ref)

    a_tile = a_ref[...]
    acc_p_ref[...] += jnp.dot(a_tile, wv_ref[0],
                              preferred_element_type=jnp.float32)
    acc_q_ref[...] += jnp.dot(a_tile, wv_ref[1],
                              preferred_element_type=jnp.float32)

    @pl.when(k == pl.num_programs(2) - 1)
    def _():
        p = acc_p_ref[...] + bc_ref[0].astype(jnp.float32)
        q = acc_q_ref[...] + bc_ref[1].astype(jnp.float32)
        o_ref[...] = (p * q).astype(o_ref.dtype)


def make_bilinear_glu(W, V, bias_b, bias_c, *, tm=256, tn=256, tk=512,
                      out_dtype=None):
    """One-time weight layout; returns apply(a) = (a@W + b) * (a@V + c).

    Weight padding and the W/V stacking into one (2, K, N) operand (single
    streaming DMA per grid step) are done here, outside the hot path.
    """
    K, N = W.shape
    assert V.shape == (K, N)
    assert bias_b.shape == (N,) and bias_c.shape == (N,)

    # Tile sizes: full extent when the dim is small (full-extent blocks are
    # exempt from the (8,128) divisibility rule), otherwise MXU-friendly,
    # 256-aligned tiles for the v6e/v7x 2x256x256 MXUs.
    btn = N if N <= tn else tn
    btk = K if K <= tk else tk
    Kp, Np = _ceil_to(K, btk), _ceil_to(N, btn)

    Wp, Vp, b1, c1 = W, V, bias_b, bias_c
    if (Kp, Np) != (K, N):
        # One-time pad (weights are parameters, not activations).
        Wp = jnp.pad(W, ((0, Kp - K), (0, Np - N)))
        Vp = jnp.pad(V, ((0, Kp - K), (0, Np - N)))
        b1 = jnp.pad(bias_b, (0, Np - N))
        c1 = jnp.pad(bias_c, (0, Np - N))
    wv = jnp.stack([Wp, Vp], axis=0)                 # (2, Kp, Np)
    bc = jnp.stack([b1, c1], axis=0)[:, None, :]     # (2, 1, Np)

    n_k = Kp // btk

    def apply(a):
        *lead, Ka = a.shape
        assert Ka == K
        M = 1
        for d in lead:
            M *= d
        a2d = a.reshape(M, K)

        btm = M if M <= tm else tm
        Mp = _ceil_to(M, btm)
        # Only the activation may need per-call padding (zero K-padding
        # contributes nothing against the zero-padded weights).
        if (Mp, Kp) != (M, K):
            a2d = jnp.pad(a2d, ((0, Mp - M), (0, Kp - K)))

        odt = out_dtype or a.dtype

        # Explicit scoped-VMEM budget from the actual tile footprint
        # (double-buffered a / wv / out + two f32 accumulators + slack).
        a_item = jnp.dtype(a.dtype).itemsize
        w_item = jnp.dtype(wv.dtype).itemsize
        o_item = jnp.dtype(odt).itemsize
        est = (2 * (btm * btk * a_item + 2 * btk * btn * w_item
                    + btm * btn * o_item)
               + 2 * btm * btn * 4 + (1 << 20))
        # NOTE: re-derive tiles if targeting v7x with very large tm/tn/tk
        # (64 MiB physical VMEM); the defaults here stay well under 32 MiB.
        vmem_limit = int(min(max(est + (4 << 20), 32 << 20), 128 << 20))

        if n_k == 1:
            grid = (Mp // btm, Np // btn)
            grid_spec = pltpu.PrefetchScalarGridSpec(
                num_scalar_prefetch=0,
                grid=grid,
                in_specs=[
                    pl.BlockSpec((btm, btk), lambda i, j: (i, 0)),       # a
                    pl.BlockSpec((2, btk, btn), lambda i, j: (0, 0, j)),  # W|V
                    pl.BlockSpec((2, 1, btn), lambda i, j: (0, 0, j)),    # b|c
                ],
                out_specs=pl.BlockSpec((btm, btn), lambda i, j: (i, j)),
            )
            kernel = _bilinear_glu_kernel_single_k
            dims = ("parallel", "parallel")
        else:
            grid = (Mp // btm, Np // btn, n_k)
            grid_spec = pltpu.PrefetchScalarGridSpec(
                num_scalar_prefetch=0,
                grid=grid,
                in_specs=[
                    pl.BlockSpec((btm, btk), lambda i, j, k: (i, k)),
                    pl.BlockSpec((2, btk, btn), lambda i, j, k: (0, k, j)),
                    pl.BlockSpec((2, 1, btn), lambda i, j, k: (0, 0, j)),
                ],
                out_specs=pl.BlockSpec((btm, btn), lambda i, j, k: (i, j)),
                scratch_shapes=[
                    pltpu.VMEM((btm, btn), jnp.float32),   # acc for a @ W
                    pltpu.VMEM((btm, btn), jnp.float32),   # acc for a @ V
                ],
            )
            kernel = _bilinear_glu_kernel_k_loop
            dims = ("parallel", "parallel", "arbitrary")

        out2d = pl.pallas_call(
            kernel,
            out_shape=jax.ShapeDtypeStruct((Mp, Np), odt),
            grid_spec=grid_spec,
            compiler_params=pltpu.CompilerParams(
                dimension_semantics=dims,
                vmem_limit_bytes=vmem_limit,
            ),
        )(a2d, wv, bc)

        return out2d[:M, :N].reshape(*lead, N)

    return apply


def bilinear_glu_pallas(a, W, V, bias_b, bias_c, **kw):
    """Convenience one-shot wrapper (weight layout not amortized)."""
    return make_bilinear_glu(W, V, bias_b, bias_c, **kw)(a)


def _reference(a, W, V, bias_b, bias_c):
    dot = functools.partial(jnp.matmul, precision=jax.lax.Precision.HIGHEST)
    af = a.astype(jnp.float32)
    return ((dot(af, W.astype(jnp.float32)) + bias_b)
            * (dot(af, V.astype(jnp.float32)) + bias_c))


def _check(a, W, V, bias_b, bias_c, rtol=2e-3, **kw):
    fn = make_bilinear_glu(W, V, bias_b, bias_c, **kw)
    y = fn(a)
    jax.block_until_ready(y)
    y_ref = _reference(a, W, V, bias_b, bias_c)
    assert y.shape == y_ref.shape and y.dtype == a.dtype
    err = jnp.max(jnp.abs(y.astype(jnp.float32) - y_ref))
    scale = jnp.max(jnp.abs(y_ref)) + 1.0
    assert err < rtol * scale, f"max abs err {err} vs scale {scale}"


if __name__ == "__main__":
    key = jax.random.PRNGKey(0)
    k0, k1, k2, k3, k4, k5 = jax.random.split(key, 6)

    # 1) Small shape consistent with the module's forward: batch=2, seq=8,
    #    hidden=32. (The second tensor argument of the PyTorch forward is
    #    unused by the reference, so it is not part of the kernel interface.)
    d = 32
    a = jax.random.normal(k0, (2, 8, d), dtype=jnp.float32)
    W = jax.random.normal(k1, (d, d), dtype=jnp.float32)
    V = jax.random.normal(k2, (d, d), dtype=jnp.float32)
    b = jax.random.normal(k3, (d,), dtype=jnp.float32)
    c = jax.random.normal(k4, (d,), dtype=jnp.float32)
    _check(a, W, V, b, c)

    # 2) Multi-step K-reduction path + multi-tile M/N grid (small tiles used
    #    only to force the K-loop code path; defaults are 256/256/512).
    M2, K2, N2 = 256, 384, 256
    a2 = jax.random.normal(k5, (M2, K2), dtype=jnp.float32)
    W2 = jax.random.normal(k1, (K2, N2), dtype=jnp.float32)
    V2 = jax.random.normal(k2, (K2, N2), dtype=jnp.float32)
    b2 = jax.random.normal(k3, (N2,), dtype=jnp.float32)
    c2 = jax.random.normal(k4, (N2,), dtype=jnp.float32)
    _check(a2, W2, V2, b2, c2, tm=128, tn=128, tk=128)

    # 3) Unaligned shapes: exercises one-time weight padding + output slice.
    M3, K3, N3 = 50, 200, 200
    a3 = jax.random.normal(k0, (M3, K3), dtype=jnp.float32)
    W3 = jax.random.normal(k1, (K3, N3), dtype=jnp.float32)
    V3 = jax.random.normal(k2, (K3, N3), dtype=jnp.float32)
    b3 = jax.random.normal(k3, (N3,), dtype=jnp.float32)
    c3 = jax.random.normal(k4, (N3,), dtype=jnp.float32)
    _check(a3, W3, V3, b3, c3, tm=128, tn=128, tk=128)

    # 4) bf16 activations/weights (f32 accumulation/epilogue inside kernel).
    _check(a.astype(jnp.bfloat16), W.astype(jnp.bfloat16),
           V.astype(jnp.bfloat16), b, c, rtol=3e-2)

    print("KERNEL_OK")
</pallas_src>

<mosaic_0001>
module attributes {stable_mosaic.version = 11 : i64} {
  func.func @_bilinear_glu_kernel_single_k(%arg0: i32, %arg1: i32, %arg2: memref<16x32xf32, #tpu.memory_space<vmem>>, %arg3: memref<2x32x32xf32, #tpu.memory_space<vmem>>, %arg4: memref<2x1x32xf32, #tpu.memory_space<vmem>>, %arg5: memref<16x32xf32, #tpu.memory_space<vmem>>) attributes {dimension_semantics = [#tpu.dimension_semantics<parallel>, #tpu.dimension_semantics<parallel>], iteration_bounds = array<i64: 1, 1>, scalar_prefetch = 0 : i64, scratch_operands = 0 : i64, tpu.core_type = #tpu.core_type<tc>, window_params = [{transform_indices = @transform_0, window_bounds = array<i64: 16, 32>}, {transform_indices = @transform_1, window_bounds = array<i64: 2, 32, 32>}, {transform_indices = @transform_2, window_bounds = array<i64: 2, 1, 32>}, {transform_indices = @transform_3, window_bounds = array<i64: 16, 32>}]} {
    %c0 = arith.constant 0 : index
    %c0_0 = arith.constant 0 : index
    %0 = vector.load %arg2[%c0, %c0_0] : memref<16x32xf32, #tpu.memory_space<vmem>>, vector<16x32xf32>
    %c0_1 = arith.constant 0 : index
    %c0_2 = arith.constant 0 : index
    %c0_3 = arith.constant 0 : index
    %1 = vector.load %arg3[%c0_1, %c0_2, %c0_3] : memref<2x32x32xf32, #tpu.memory_space<vmem>>, vector<1x32x32xf32>
    %2 = vector.shape_cast %1 : vector<1x32x32xf32> to vector<32x32xf32>
    %cst = arith.constant dense<0.000000e+00> : vector<16x32xf32>
    %3 = tpu.matmul %0, %2, %cst {dimension_numbers = #tpu.dot_dimension_numbers<[1], [0], [0], [1], [0, 0, 1, 1], [], []>} : vector<16x32xf32>, vector<32x32xf32>, vector<16x32xf32> -> vector<16x32xf32>
    %c1 = arith.constant 1 : index
    %c0_4 = arith.constant 0 : index
    %c0_5 = arith.constant 0 : index
    %4 = vector.load %arg3[%c1, %c0_4, %c0_5] : memref<2x32x32xf32, #tpu.memory_space<vmem>>, vector<1x32x32xf32>
    %5 = vector.shape_cast %4 : vector<1x32x32xf32> to vector<32x32xf32>
    %cst_6 = arith.constant dense<0.000000e+00> : vector<16x32xf32>
    %6 = tpu.matmul %0, %5, %cst_6 {dimension_numbers = #tpu.dot_dimension_numbers<[1], [0], [0], [1], [0, 0, 1, 1], [], []>} : vector<16x32xf32>, vector<32x32xf32>, vector<16x32xf32> -> vector<16x32xf32>
    %c0_7 = arith.constant 0 : index
    %c0_8 = arith.constant 0 : index
    %c0_9 = arith.constant 0 : index
    %7 = vector.load %arg4[%c0_7, %c0_8, %c0_9] : memref<2x1x32xf32, #tpu.memory_space<vmem>>, vector<1x1x32xf32>
    %8 = vector.shape_cast %7 : vector<1x1x32xf32> to vector<1x32xf32>
    %9 = vector.broadcast %8 : vector<1x32xf32> to vector<16x32xf32>
    %10 = arith.addf %3, %9 : vector<16x32xf32>
    %c1_10 = arith.constant 1 : index
    %c0_11 = arith.constant 0 : index
    %c0_12 = arith.constant 0 : index
    %11 = vector.load %arg4[%c1_10, %c0_11, %c0_12] : memref<2x1x32xf32, #tpu.memory_space<vmem>>, vector<1x1x32xf32>
    %12 = vector.shape_cast %11 : vector<1x1x32xf32> to vector<1x32xf32>
    %13 = vector.broadcast %12 : vector<1x32xf32> to vector<16x32xf32>
    %14 = arith.addf %6, %13 : vector<16x32xf32>
    %15 = arith.mulf %10, %14 : vector<16x32xf32>
    %c0_13 = arith.constant 0 : index
    %c0_14 = arith.constant 0 : index
    %16 = vector.load %arg5[%c0_13, %c0_14] : memref<16x32xf32, #tpu.memory_space<vmem>>, vector<16x32xf32>
    tpu.vector_store %arg5[%c0_13, %c0_14], %15 {strides = array<i32>} : memref<16x32xf32, #tpu.memory_space<vmem>>, vector<16x32xf32>,
    return
  }
  func.func @transform_0(%arg0: i32, %arg1: i32) -> (i32, i32) {
    %c0_i32 = arith.constant 0 : i32
    %c0_i32_0 = arith.constant 0 : i32
    return %arg0, %c0_i32 : i32, i32
  }
  func.func @transform_1(%arg0: i32, %arg1: i32) -> (i32, i32, i32) {
    %c0_i32 = arith.constant 0 : i32
    %c0_i32_0 = arith.constant 0 : i32
    %c0_i32_1 = arith.constant 0 : i32
    return %c0_i32, %c0_i32_0, %arg1 : i32, i32, i32
  }
  func.func @transform_2(%arg0: i32, %arg1: i32) -> (i32, i32, i32) {
    %c0_i32 = arith.constant 0 : i32
    %c0_i32_0 = arith.constant 0 : i32
    %c0_i32_1 = arith.constant 0 : i32
    return %c0_i32, %c0_i32_0, %arg1 : i32, i32, i32
  }
  func.func @transform_3(%arg0: i32, %arg1: i32) -> (i32, i32) {
    %c0_i32 = arith.constant 0 : i32
    return %arg0, %arg1 : i32, i32
  }
}

</mosaic_0001>

<bundles_post_ra>
// kernel: tpu_custom_call.1
= control target key start
LH: loop header
LB: loop body
LE: loop exit
PB: predicated region body
PF: predicated region fallthrough
CT: control target
= control target key end

     0   :  { %8 = vsyncpa [#allocation3], 0  ;;  %s464_s0 = inlined_call_operand.hbm [shape: f32[16,32], index: 0, kind: input, shape index: {}]   ;;  %s465_s1 = inlined_call_operand.hbm [shape: f32[2,32,32], index: 1, kind: input, shape index: {}]   ;;  %s466_s2 = inlined_call_operand.vmem [shape: f32[2,1,32], index: 2, kind: input, shape index: {}]   ;;  %s467_s3 = inlined_call_operand.hbm [shape: f32[16,32], index: 3, kind: output, shape index: {}]  }
   0x1   :  { %9 = vsyncpa [#allocation6], 0 }
   0x2   :  { %10 = vsyncpa [#allocation4], 0  ;;  %s382_s12 = smov [#allocation2]   ;;  %s310_s16 = scalar_lea.hbm %s464_s0, 256 }
   0x3   :  { %s16_s13 = sshll.u32 %s382_s12, 4  ;;  %p311_p0 = scmp.ne.s32.totalorder %s464_s0, %s310_s16  ;;  %s17_s13 = int_to_ptr.vmem [resolvable:$true] %s16_s13 }
   0x4   :  { %p314_p1 = scmp.lt.u32.totalorder %s310_s16, %s464_s0 }
   0x6   :  { %p316_p2 = pnand %p314_p1, %p311_p0 }
   0x8   :  { %319 = shalt.err (!%p316_p2)
}
   0x9   :  { %s320_s21 = scalar_lea.vmem %s17_s13, 256  ;;  %p325_p4 = scmp.lt.s32.totalorder %s17_s13, %s17_s13 }
   0xa   :  { %p321_p3 = scmp.ne.s32.totalorder %s17_s13, %s320_s21  ;;  %p326_p5 = scmp.lt.s32.totalorder %s320_s21, %s320_s21 }
   0xc   :  { %p327_p6 = por %p326_p5, %p325_p4 }
   0xe   :  { %p328_p7 = pnand %p327_p6, %p321_p3 }
  0x10   :  { %331 = shalt.err (!%p328_p7)
}
  0x11   :  { %s383_s22 = smov 128   ;;  %s384_s23 = smov 8  }
  0x12   :  { %22 = dma.hbm_to_vmem [thread:$0]  %s464_s0, 256, %s17_s13, [#allocation3], %s383_s22, %s383_s22, %s384_s23  }
  0x13   :  { %s385_s26 = smov [#allocation5]   ;;  %s332_s30 = scalar_lea.hbm %s465_s1, 1024 }
  0x14   :  { %s28_s27 = sshll.u32 %s385_s26, 4  ;;  %p333_p8 = scmp.ne.s32.totalorder %s465_s1, %s332_s30  ;;  %s29_s27 = int_to_ptr.vmem [resolvable:$true] %s28_s27 }
  0x15   :  { %p336_p9 = scmp.lt.u32.totalorder %s332_s30, %s465_s1 }
  0x17   :  { %p338_p10 = pnand %p336_p9, %p333_p8 }
  0x19   :  { %341 = shalt.err (!%p338_p10)
}
  0x1a   :  { %s342_s8 = scalar_lea.vmem %s29_s27, 1024  ;;  %p347_p12 = scmp.lt.s32.totalorder %s29_s27, %s29_s27 }
  0x1b   :  { %p343_p11 = scmp.ne.s32.totalorder %s29_s27, %s342_s8  ;;  %p348_p13 = scmp.lt.s32.totalorder %s342_s8, %s342_s8 }
  0x1d   :  { %p349_p0 = por %p348_p13, %p347_p12 }
  0x1f   :  { %p350_p1 = pnand %p349_p0, %p343_p11 }
  0x21   :  { %353 = shalt.err (!%p350_p1)
}
  0x22   :  { %34 = dma.hbm_to_vmem [thread:$0]  %s465_s1, 1024, %s29_s27, [#allocation6], %s383_s22, %s383_s22, %s384_s23  }
  0x23   :  { %376 = dma.done.wait [#allocation3], 256  }
  0x24   :  { %377 = vsyncadd [#allocation3], 4294967040 }
  0x25   :  { %378 = dma.done.wait [#allocation6], 1024  }
  0x26   :  { %379 = vsyncadd [#allocation6], 4294966272  ;;  %v45_v0 = vld [vmem:[#allocation5] sm:$0xff]  ;;  %v46_v1 = vld [vmem:[#allocation5 + $0x8] sm:$0xff]  ;;  %vm61_vm0 = vcmask 261120   ;;  %s386_s13 = smov [#allocation7]  }
  0x27   :  { %v50_v2 = vld [vmem:[#allocation5 + $0x20] sm:$0xff]  ;;  %v289_v3 = vpack.c.bf16 %v46_v1, %v45_v0  ;;  %v51_v4 = vld [vmem:[#allocation5 + $0x28] sm:$0xff]  ;;  %v47_v5 = vld [vmem:[#allocation5 + $0x10] sm:$0xff]  ;;  %s235_s14 = sshll.u32 %s386_s13, 4  ;;  %s236_s14 = int_to_ptr.vmem [resolvable:$true] %s235_s14 }
  0x28   :  { %v48_v6 = vld [vmem:[#allocation5 + $0x18] sm:$0xff]  ;;  %v297_v7 = vpack.c.bf16 %v51_v4, %v50_v2  ;;  %v52_v9 = vld [vmem:[#allocation5 + $0x30] sm:$0xff]  ;;  %s354_s15 = scalar_lea.vmem %s236_s14, 256  ;;  %p359_p3 = scmp.lt.s32.totalorder %s236_s14, %s236_s14 }
  0x29   :  { %v293_v8 = vpack.c.bf16 %v48_v6, %v47_v5  ;;  %v53_v10 = vld [vmem:[#allocation5 + $0x38] sm:$0xff]  ;;  %v43_v11 = vld [vmem:[#allocation2] sm:$0xff]  ;;  %290 = vmatprep.subr.bf16.mxu0 %v289_v3  ;;  %p355_p2 = scmp.ne.s32.totalorder %s236_s14, %s354_s15  ;;  %p360_p4 = scmp.lt.s32.totalorder %s354_s15, %s354_s15 }
  0x2a   :  { %v301_v12 = vpack.c.bf16 %v53_v10, %v52_v9  ;;  %275 = vmatprep.mubr.msk.f32.mxu0 %vm61_vm0, %v43_v11  ;;  %298 = vmatprep.subr.bf16.mxu1 %v297_v7  ;;  %v44_v13 = vld [vmem:[#allocation2 + $0x8] sm:$0xff]  ;;  %v248_v14 = vld [vmem:[%s466_s2] ss:$0 sm:$0xff]  ;;  %v252_v15 = vld [vmem:[%s466_s2 + $0x1] ss:$0 sm:$0xff] }
  0x2b   :  { %292 = vmatpush3.bf16.msra.mxu0 %v289_v3  ;;  %300 = vmatpush3.bf16.msra.mxu1 %v297_v7  ;;  %p361_p5 = por %p360_p4, %p359_p3 }
  0x2c   :  { %294 = vmatprep.subr.bf16.mxu0 %v293_v8  ;;  %302 = vmatprep.subr.bf16.mxu1 %v301_v12 }
  0x2d   :  { %286 = vmatprep.mubr.msk.f32.mxu1 %vm61_vm0, %v43_v11  ;;  %p362_p6 = pnand %p361_p5, %p355_p2 }
  0x2f   :  { %296 = vmatpush3.bf16.msra.mxu0 %v293_v8  ;;  %304 = vmatpush3.bf16.msra.mxu1 %v301_v12 }
  0x32   :  { %276 = vmatmul.mubr.msk.f32.vlgmr.msra.gmra.mrb[0].mxu0 %vm61_vm0, %v44_v13  ;;  %287 = vmatmul.mubr.msk.f32.vlgmr.msra.gmra.mrb[0].mxu1 %vm61_vm0, %v44_v13 }
 0x105   :  { %v277_v16 = vpop.f32.mrb[0].mxu0  ;;  %v288_v18 = vpop.f32.mrb[0].mxu1 }
 0x106   :  { %v140_v17 = vadd.f32 %v277_v16, %v248_v14  ;;  %v134_v19 = vpop.f32.mrb[1].mxu0  ;;  %v223_v20 = vadd.f32 %v288_v18, %v252_v15  ;;  %v217_v22 = vpop.f32.mrb[1].mxu1 }
 0x107   :  { %v135_v21 = vadd.f32 %v248_v14, %v134_v19  ;;  %v218_v23 = vadd.f32 %v252_v15, %v217_v22 }
 0x108   :  { %v227_v24 = vmul.f32 %v223_v20, %v140_v17 }
 0x109   :  { %v226_v25 = vmul.f32 %v218_v23, %v135_v21 }
 0x10a   :  { %229 = vst.msk [vmem:[#allocation7 + $0x8] sm:$0xff] %vm61_vm0, %v227_v24 }
 0x10b   :  { %228 = vst.msk [vmem:[#allocation7] sm:$0xff] %vm61_vm0, %v226_v25 }
 0x10c   :  { %365 = shalt.err (!%p362_p6)
}
 0x10d   :  { %s366_s17 = scalar_lea.hbm %s467_s3, 256 }
 0x10e   :  { %p367_p7 = scmp.ne.s32.totalorder %s467_s3, %s366_s17  ;;  %p370_p8 = scmp.lt.u32.totalorder %s366_s17, %s467_s3 }
 0x110   :  { %p372_p9 = pnand %p370_p8, %p367_p7 }
 0x112   :  { %375 = shalt.err (!%p372_p9)
}
 0x113   :  { %241 = dma.vmem_to_hbm [thread:$0]  %s236_s14, 256, %s467_s3, [#allocation4], %s383_s22, %s383_s22, %s384_s23  }
 0x114   :  { %380 = dma.done.wait [#allocation4], 256  }
 0x115   :  { %381 = vsyncadd [#allocation4], 4294967040 }
 0x116   :  { %245 = vsyncpa [#allocation3], 1 }
 0x117   :  { %246 = vsyncpa [#allocation6], 1 }
 0x118   :  { %247 = vsyncpa [#allocation4], 1 }

</bundles_post_ra>
